<compile_context>
chip_gen: v7x
topology: tpu7x:2x2x1
jax: 0.10.0
libtpu: 0.0.40
codegen_flags: <defaults>
</compile_context>

<pallas_src>
import math

import jax
import jax.numpy as jnp
from jax.experimental import pallas as pl
from jax.experimental.pallas import tpu as pltpu


_LANES = 128
_MAX_ROW_GROUPS_PER_TILE = 1024   # 1024 sublane-groups * 128 rows per grid step


def _round_up(a, b):
    return (a + b - 1) // b * b


def _scale_rows_kernel(x_ref, scale_ref, expand_ref, o_ref):
    """x_ref/o_ref: (TG, 128*C); scale_ref: (TG, 128); expand_ref: (128, 128*C).

    expand[j, C*j + k] = 1, so scale @ expand replicates each per-row scale
    across that row's C lanes (MXU does the lane expansion).
    """
    scale_wide = jnp.dot(scale_ref[...], expand_ref[...],
                         preferred_element_type=jnp.float32)
    o_ref[...] = (x_ref[...].astype(jnp.float32) * scale_wide).astype(o_ref.dtype)


def _scale_elems_kernel(x_ref, scale_ref, o_ref):
    """Element-wise scale (scalar dropout): all refs are (TG, 128)."""
    o_ref[...] = (x_ref[...].astype(jnp.float32) * scale_ref[...]).astype(o_ref.dtype)


def _apply_row_scale(x, row_scale, C):
    """out.flat[r*C + c] = x.flat[r*C + c] * row_scale[r]  (lane-dense Pallas kernel)."""
    orig_shape = x.shape
    orig_dtype = x.dtype
    R = row_scale.shape[0]                      # number of "rows" (mask entries)

    # Pad rows so R is a multiple of 128 * TG, with TG a multiple of 16.
    g_needed = pl.cdiv(R, _LANES)
    tg = min(_MAX_ROW_GROUPS_PER_TILE, _round_up(g_needed, 16))
    G = _round_up(g_needed, tg)
    Rp = G * _LANES

    flat = x.reshape(-1)
    if Rp != R:
        flat = jnp.pad(flat, (0, (Rp - R) * C))
        row_scale = jnp.pad(row_scale, (0, Rp - R))
    xg = flat.reshape(G, _LANES * C)
    sg = row_scale.astype(jnp.float32).reshape(G, _LANES)

    grid = (G // tg,)

    if C == 1:
        out = pl.pallas_call(
            _scale_elems_kernel,
            out_shape=jax.ShapeDtypeStruct((G, _LANES), orig_dtype),
            grid=grid,
            in_specs=[pl.BlockSpec((tg, _LANES), lambda i: (i, 0)),
                      pl.BlockSpec((tg, _LANES), lambda i: (i, 0))],
            out_specs=pl.BlockSpec((tg, _LANES), lambda i: (i, 0)),
            compiler_params=pltpu.CompilerParams(
                dimension_semantics=("parallel",)),
        )(xg, sg)
    else:
        # Constant lane-expansion matrix: expand[j, C*j + k] = 1.
        expand = (jnp.arange(_LANES * C)[None, :] // C
                  == jnp.arange(_LANES)[:, None]).astype(jnp.float32)
        out = pl.pallas_call(
            _scale_rows_kernel,
            out_shape=jax.ShapeDtypeStruct((G, _LANES * C), orig_dtype),
            grid=grid,
            in_specs=[pl.BlockSpec((tg, _LANES * C), lambda i: (i, 0)),
                      pl.BlockSpec((tg, _LANES), lambda i: (i, 0)),
                      pl.BlockSpec((_LANES, _LANES * C), lambda i: (0, 0))],
            out_specs=pl.BlockSpec((tg, _LANES * C), lambda i: (i, 0)),
            compiler_params=pltpu.CompilerParams(
                dimension_semantics=("parallel",)),
        )(xg, sg, expand)

    out_flat = out.reshape(-1)
    if Rp != R:
        out_flat = out_flat[: R * C]
    return out_flat.reshape(orig_shape)


def sdropout(x, drop_rate, key, *, training=True):
    """nn.Dropout equivalent (element-wise)."""
    if not training or drop_rate == 0.0:
        return x
    if drop_rate >= 1.0:
        return jnp.zeros_like(x)
    keep = 1.0 - float(drop_rate)
    n = int(x.size)
    keep_mask = jax.random.bernoulli(key, p=keep, shape=(n,))
    scale = jnp.where(keep_mask, jnp.float32(1.0 / keep), jnp.float32(0.0))
    return _apply_row_scale(x, scale, 1)


def vdropout(x, drop_rate, key, *, training=True):
    """_VDropout equivalent: one mask per x.shape[:-1] index, broadcast over last dim."""
    if not training or drop_rate == 0.0:
        return x
    if drop_rate >= 1.0:
        return jnp.zeros_like(x)
    keep = 1.0 - float(drop_rate)
    R = math.prod(x.shape[:-1]) if len(x.shape) > 1 else 1
    C = int(x.shape[-1])
    keep_mask = jax.random.bernoulli(key, p=keep, shape=(R,))
    row_scale = jnp.where(keep_mask, jnp.float32(1.0 / keep), jnp.float32(0.0))
    return _apply_row_scale(x, row_scale, C)


def dropout(x, drop_rate, key, *, training=True):
    """gvp.Dropout.forward: tuple (s, V) -> (sdropout(s), vdropout(V)); single array -> sdropout."""
    if isinstance(x, (tuple, list)):
        s, v = x
        ks, kv = jax.random.split(key)
        return (sdropout(s, drop_rate, ks, training=training),
                vdropout(v, drop_rate, kv, training=training))
    return sdropout(x, drop_rate, key, training=training)


if __name__ == "__main__":
    root = jax.random.PRNGKey(0)
    k_s, k_v, k_drop = jax.random.split(root, 3)

    # GVP features: scalar channels (num_nodes, 32), vector channels (num_nodes, 16, 3)
    num_nodes, scalar_dim, vec_channels = 8, 32, 16
    s = jax.random.normal(k_s, (num_nodes, scalar_dim), dtype=jnp.float32)
    v = jax.random.normal(k_v, (num_nodes, vec_channels, 3), dtype=jnp.float32)

    drop_rate = 0.25
    keep = 1.0 - drop_rate

    # Training mode on the (s, V) tuple.
    s_out, v_out = dropout((s, v), drop_rate, k_drop, training=True)
    s_out = jax.block_until_ready(s_out)
    v_out = jax.block_until_ready(v_out)

    # Scalar path: each element is either 0 or x / keep.
    err_keep_s = jnp.abs(s_out - s / keep)
    err_drop_s = jnp.abs(s_out)
    assert bool(jnp.all(jnp.minimum(err_keep_s, err_drop_s) < 1e-4))

    # Vector path: whole vector channels are kept or dropped together.
    vk = jnp.max(jnp.abs(v_out - v / keep), axis=-1)   # kept-row residual
    vd = jnp.max(jnp.abs(v_out), axis=-1)              # dropped-row residual
    assert bool(jnp.all(jnp.minimum(vk, vd) < 1e-4))
    assert bool(jnp.all((vk < 1e-4) | (vd < 1e-4))), "rows must be dropped or kept together"

    # Eval mode: identity.
    s_eval, v_eval = dropout((s, v), drop_rate, k_drop, training=False)
    assert bool(jnp.all(s_eval == s)) and bool(jnp.all(v_eval == v))

    # Single-tensor input path (treated as scalar channels).
    y = dropout(s, drop_rate, k_drop, training=True)
    jax.block_until_ready(y)

    print("KERNEL_OK")
</pallas_src>

<mosaic_0001>
module attributes {stable_mosaic.version = 11 : i64} {
  func.func @_scale_elems_kernel(%arg0: i32, %arg1: memref<16x128xf32, #tpu.memory_space<vmem>>, %arg2: memref<16x128xf32, #tpu.memory_space<vmem>>, %arg3: memref<16x128xf32, #tpu.memory_space<vmem>>) attributes {dimension_semantics = [#tpu.dimension_semantics<parallel>], iteration_bounds = array<i64: 1>, scalar_prefetch = 0 : i64, scratch_operands = 0 : i64, tpu.core_type = #tpu.core_type<tc>, window_params = [{transform_indices = @transform_0, window_bounds = array<i64: 16, 128>}, {transform_indices = @transform_1, window_bounds = array<i64: 16, 128>}, {transform_indices = @transform_2, window_bounds = array<i64: 16, 128>}]} {
    %c0 = arith.constant 0 : index
    %c0_0 = arith.constant 0 : index
    %0 = vector.load %arg1[%c0, %c0_0] : memref<16x128xf32, #tpu.memory_space<vmem>>, vector<16x128xf32>
    %c0_1 = arith.constant 0 : index
    %c0_2 = arith.constant 0 : index
    %1 = vector.load %arg2[%c0_1, %c0_2] : memref<16x128xf32, #tpu.memory_space<vmem>>, vector<16x128xf32>
    %2 = arith.mulf %0, %1 : vector<16x128xf32>
    %c0_3 = arith.constant 0 : index
    %c0_4 = arith.constant 0 : index
    %3 = vector.load %arg3[%c0_3, %c0_4] : memref<16x128xf32, #tpu.memory_space<vmem>>, vector<16x128xf32>
    tpu.vector_store %arg3[%c0_3, %c0_4], %2 {strides = array<i32>} : memref<16x128xf32, #tpu.memory_space<vmem>>, vector<16x128xf32>,
    return
  }
  func.func @transform_0(%arg0: i32) -> (i32, i32) {
    %c0_i32 = arith.constant 0 : i32
    %c0_i32_0 = arith.constant 0 : i32
    return %arg0, %c0_i32 : i32, i32
  }
  func.func @transform_1(%arg0: i32) -> (i32, i32) {
    %c0_i32 = arith.constant 0 : i32
    %c0_i32_0 = arith.constant 0 : i32
    return %arg0, %c0_i32 : i32, i32
  }
  func.func @transform_2(%arg0: i32) -> (i32, i32) {
    %c0_i32 = arith.constant 0 : i32
    %c0_i32_0 = arith.constant 0 : i32
    return %arg0, %c0_i32 : i32, i32
  }
}

</mosaic_0001>

<bundles_post_ra>
// kernel: tpu_custom_call.1
= control target key start
LH: loop header
LB: loop body
LE: loop exit
PB: predicated region body
PF: predicated region fallthrough
CT: control target
= control target key end

     0   :  { %7 = vsyncpa [#allocation3], 0  ;;  %s208_s0 = inlined_call_operand.hbm [shape: f32[16,128], index: 0, kind: input, shape index: {}]   ;;  %s209_s1 = inlined_call_operand.hbm [shape: f32[16,128], index: 1, kind: input, shape index: {}]   ;;  %s210_s2 = inlined_call_operand.hbm [shape: f32[16,128], index: 2, kind: output, shape index: {}]  }
   0x1   :  { %8 = vsyncpa [#allocation6], 0 }
   0x2   :  { %9 = vsyncpa [#allocation4], 0  ;;  %s143_s9 = smov [#allocation2]   ;;  %s71_s13 = scalar_lea.hbm %s208_s0, 256 }
   0x3   :  { %s15_s10 = sshll.u32 %s143_s9, 4  ;;  %p72_p0 = scmp.ne.s32.totalorder %s208_s0, %s71_s13  ;;  %s16_s10 = int_to_ptr.vmem [resolvable:$true] %s15_s10 }
   0x4   :  { %p75_p1 = scmp.lt.u32.totalorder %s71_s13, %s208_s0 }
   0x6   :  { %p77_p2 = pnand %p75_p1, %p72_p0 }
   0x8   :  { %80 = shalt.err (!%p77_p2)
}
   0x9   :  { %s81_s18 = scalar_lea.vmem %s16_s10, 256  ;;  %p86_p4 = scmp.lt.s32.totalorder %s16_s10, %s16_s10 }
   0xa   :  { %p82_p3 = scmp.ne.s32.totalorder %s16_s10, %s81_s18  ;;  %p87_p5 = scmp.lt.s32.totalorder %s81_s18, %s81_s18 }
   0xc   :  { %p88_p6 = por %p87_p5, %p86_p4 }
   0xe   :  { %p89_p7 = pnand %p88_p6, %p82_p3 }
  0x10   :  { %92 = shalt.err (!%p89_p7)
}
  0x11   :  { %s144_s19 = smov 128   ;;  %s145_s20 = smov 8  }
  0x12   :  { %21 = dma.hbm_to_vmem [thread:$0]  %s208_s0, 256, %s16_s10, [#allocation3], %s144_s19, %s144_s19, %s145_s20  }
  0x13   :  { %s146_s23 = smov [#allocation5]   ;;  %s93_s27 = scalar_lea.hbm %s209_s1, 256 }
  0x14   :  { %s27_s24 = sshll.u32 %s146_s23, 4  ;;  %p94_p8 = scmp.ne.s32.totalorder %s209_s1, %s93_s27  ;;  %s28_s24 = int_to_ptr.vmem [resolvable:$true] %s27_s24 }
  0x15   :  { %p97_p9 = scmp.lt.u32.totalorder %s93_s27, %s209_s1 }
  0x17   :  { %p99_p10 = pnand %p97_p9, %p94_p8 }
  0x19   :  { %102 = shalt.err (!%p99_p10)
}
  0x1a   :  { %s103_s4 = scalar_lea.vmem %s28_s24, 256  ;;  %p108_p12 = scmp.lt.s32.totalorder %s28_s24, %s28_s24 }
  0x1b   :  { %p104_p11 = scmp.ne.s32.totalorder %s28_s24, %s103_s4  ;;  %p109_p13 = scmp.lt.s32.totalorder %s103_s4, %s103_s4 }
  0x1d   :  { %p110_p0 = por %p109_p13, %p108_p12 }
  0x1f   :  { %p111_p1 = pnand %p110_p0, %p104_p11 }
  0x21   :  { %114 = shalt.err (!%p111_p1)
}
  0x22   :  { %33 = dma.hbm_to_vmem [thread:$0]  %s209_s1, 256, %s28_s24, [#allocation6], %s144_s19, %s144_s19, %s145_s20  }
  0x23   :  { %137 = dma.done.wait [#allocation3], 256  }
  0x24   :  { %138 = vsyncadd [#allocation3], 4294967040 }
  0x25   :  { %139 = dma.done.wait [#allocation6], 256  }
  0x26   :  { %140 = vsyncadd [#allocation6], 4294967040  ;;  %s147_s6 = smov [#allocation7]   ;;  %v40_v0 = vld [vmem:[#allocation2] sm:$0xff]  ;;  %v42_v1 = vld [vmem:[#allocation5] sm:$0xff] }
  0x27   :  { %s53_s7 = sshll.u32 %s147_s6, 4  ;;  %v41_v2 = vld [vmem:[#allocation2 + $0x8] sm:$0xff]  ;;  %v44_v3 = vmul.f32 %v42_v1, %v40_v0  ;;  %v43_v4 = vld [vmem:[#allocation5 + $0x8] sm:$0xff]  ;;  %s54_s7 = int_to_ptr.vmem [resolvable:$true] %s53_s7 }
  0x28   :  { %v45_v5 = vmul.f32 %v43_v4, %v41_v2  ;;  %s115_s8 = scalar_lea.vmem %s54_s7, 256  ;;  %p120_p3 = scmp.lt.s32.totalorder %s54_s7, %s54_s7 }
  0x29   :  { %46 = vst [vmem:[#allocation7] sm:$0xff] %v44_v3  ;;  %p116_p2 = scmp.ne.s32.totalorder %s54_s7, %s115_s8  ;;  %p121_p4 = scmp.lt.s32.totalorder %s115_s8, %s115_s8 }
  0x2a   :  { %47 = vst [vmem:[#allocation7 + $0x8] sm:$0xff] %v45_v5 }
  0x2b   :  { %p122_p5 = por %p121_p4, %p120_p3 }
  0x2d   :  { %p123_p6 = pnand %p122_p5, %p116_p2 }
  0x2f   :  { %126 = shalt.err (!%p123_p6)
}
  0x30   :  { %s127_s10 = scalar_lea.hbm %s210_s2, 256 }
  0x31   :  { %p128_p7 = scmp.ne.s32.totalorder %s210_s2, %s127_s10  ;;  %p131_p8 = scmp.lt.u32.totalorder %s127_s10, %s210_s2 }
  0x33   :  { %p133_p9 = pnand %p131_p8, %p128_p7 }
  0x35   :  { %136 = shalt.err (!%p133_p9)
}
  0x36   :  { %59 = dma.vmem_to_hbm [thread:$0]  %s54_s7, 256, %s210_s2, [#allocation4], %s144_s19, %s144_s19, %s145_s20  }
  0x37   :  { %141 = dma.done.wait [#allocation4], 256  }
  0x38   :  { %142 = vsyncadd [#allocation4], 4294967040 }
  0x39   :  { %63 = vsyncpa [#allocation3], 1 }
  0x3a   :  { %64 = vsyncpa [#allocation6], 1 }
  0x3b   :  { %65 = vsyncpa [#allocation4], 1 }

</bundles_post_ra>
